<compile_context>
chip_gen: v7x
topology: tpu7x:2x2x1
jax: 0.10.0
libtpu: 0.0.40
codegen_flags: <defaults>
</compile_context>

<pallas_src>
import functools

import jax
import jax.numpy as jnp
from jax import lax
from jax.experimental import pallas as pl
from jax.experimental.pallas import tpu as pltpu

EPS = 1e-5


def _round_up(x, m):
    return (x + m - 1) // m * m


def _k_align(k):
    # Lane-dense K once it is big enough to matter; cheap 16-alignment otherwise.
    return _round_up(k, 128) if k >= 128 else _round_up(k, 16)


def _pad2d(a, rows, cols):
    return jnp.pad(a, ((0, rows - a.shape[0]), (0, cols - a.shape[1])))


def _vmem_limit_bytes():
    # Generation-conditional scoped-VMEM cap: ~3/4 of physical, capped at 96 MiB
    # (v5e/v6e: 96 of 128 MiB; v7x: 48 of 64 MiB).  Safe 32 MiB fallback.
    try:
        cap = int(pltpu.get_tpu_info().vmem_capacity_bytes)
        return int(min(96 * 1024 * 1024, (cap * 3) // 4))
    except Exception:
        return 32 * 1024 * 1024


_VMEM_LIMIT = _vmem_limit_bytes()


# ----------------------------------------------------------------------------
# Kernel A: stage-1 wide GEMM (conv_1 [+ conv_3]) + per-tile BN partial stats
# ----------------------------------------------------------------------------
def _gemm_stats_kernel(p_ref, w_ref, *out_refs, num_gemms, cp):
    y_refs = out_refs[:num_gemms]
    st_refs = out_refs[num_gemms:]
    # One wide MXU dot covering all concatenated weight columns.
    z = jnp.dot(p_ref[...], w_ref[...], preferred_element_type=jnp.float32)
    for g in range(num_gemms):
        y = z[:, g * cp:(g + 1) * cp]                # lane slice, 128-aligned
        y_refs[g][...] = y.astype(y_refs[g].dtype)   # bf16 store
        st_refs[g][...] = jnp.zeros_like(st_refs[g])
        st_refs[g][0:1, :] = jnp.sum(y, axis=0, keepdims=True)
        st_refs[g][1:2, :] = jnp.sum(y * y, axis=0, keepdims=True)


def _gemm_stats(patches, wcat, num_gemms, cp, tm):
    mp, kp = patches.shape
    nt = mp // tm
    row = pl.BlockSpec((tm, cp), lambda i: (i, 0))
    st = pl.BlockSpec((8, cp), lambda i: (i, 0))     # per-tile partial stats
    outs = pl.pallas_call(
        functools.partial(_gemm_stats_kernel, num_gemms=num_gemms, cp=cp),
        grid=(nt,),
        out_shape=tuple(
            [jax.ShapeDtypeStruct((mp, cp), jnp.bfloat16)] * num_gemms
            + [jax.ShapeDtypeStruct((nt * 8, cp), jnp.float32)] * num_gemms),
        in_specs=[pl.BlockSpec((tm, kp), lambda i: (i, 0)),
                  pl.BlockSpec((kp, num_gemms * cp), lambda i: (0, 0))],
        out_specs=tuple([row] * num_gemms + [st] * num_gemms),
        compiler_params=pltpu.CompilerParams(
            dimension_semantics=("parallel",),       # no cross-tile accumulation
            vmem_limit_bytes=_VMEM_LIMIT),
    )(patches, wcat)
    return outs[:num_gemms], outs[num_gemms:]


# ----------------------------------------------------------------------------
# Kernel B: fused BN1+ReLU + conv_2 via in-VMEM halo (9 shifted dots) + stats
# ----------------------------------------------------------------------------
def _fused_bn_conv_stats_kernel(y1_ref, s_ref, b_ref, w_ref, y2_ref, st_ref,
                                hp_ref, *, ksize, ho, wo, pad):
    m, cp = y1_ref.shape                       # m = ho*wo rows of one image
    halo = pad * wo + pad
    # stage-1 BatchNorm + ReLU applied in registers (no HBM intermediate).
    h = jnp.maximum(y1_ref[...].astype(jnp.float32) * s_ref[...] + b_ref[...],
                    0.0)
    hp_ref[...] = jnp.zeros_like(hp_ref)       # zero halo (spatial padding)
    hp_ref[halo:halo + m, :] = h.astype(jnp.bfloat16)

    col = lax.broadcasted_iota(jnp.int32, (m, 1), 0) % wo
    acc = jnp.zeros((m, cp), jnp.float32)
    for kh in range(ksize):
        for kw in range(ksize):
            dh, dw = kh - pad, kw - pad
            shift = dh * wo + dw
            xs = hp_ref[halo + shift:halo + shift + m, :]
            if dw != 0:                        # mask width wrap-around rows
                keep = jnp.logical_and(col + dw >= 0, col + dw < wo)
                xs = jnp.where(keep, xs, jnp.zeros_like(xs))
            acc = acc + jnp.dot(xs, w_ref[kh * ksize + kw],
                                preferred_element_type=jnp.float32)
    y2_ref[...] = acc.astype(y2_ref.dtype)     # bf16 store
    st_ref[...] = jnp.zeros_like(st_ref)
    st_ref[0:1, :] = jnp.sum(acc, axis=0, keepdims=True)
    st_ref[1:2, :] = jnp.sum(acc * acc, axis=0, keepdims=True)


def _conv2_bn_stats(y1, s1, sh1, w2r, n, ho, wo, cp, ksize, pad):
    m1 = n * ho * wo
    mimg = ho * wo
    halo = pad * wo + pad
    vec = pl.BlockSpec((1, cp), lambda i: (0, 0))
    return pl.pallas_call(
        functools.partial(_fused_bn_conv_stats_kernel,
                          ksize=ksize, ho=ho, wo=wo, pad=pad),
        grid=(n,),
        out_shape=(jax.ShapeDtypeStruct((m1, cp), jnp.bfloat16),
                   jax.ShapeDtypeStruct((n * 8, cp), jnp.float32)),
        in_specs=[pl.BlockSpec((mimg, cp), lambda i: (i, 0)),
                  vec, vec,
                  pl.BlockSpec((ksize * ksize, cp, cp), lambda i: (0, 0, 0))],
        out_specs=(pl.BlockSpec((mimg, cp), lambda i: (i, 0)),
                   pl.BlockSpec((8, cp), lambda i: (i, 0))),
        scratch_shapes=[pltpu.VMEM((mimg + 2 * halo, cp), jnp.bfloat16)],
        compiler_params=pltpu.CompilerParams(
            dimension_semantics=("parallel",),
            vmem_limit_bytes=_VMEM_LIMIT),
    )(y1, s1, sh1, w2r)


# ----------------------------------------------------------------------------
# Kernel C: BN2 + (BN3 residual | identity) + add + ReLU
# ----------------------------------------------------------------------------
def _bn_add_relu_kernel(y_ref, s_ref, b_ref, r_ref, rs_ref, rb_ref, o_ref):
    main = y_ref[...].astype(jnp.float32) * s_ref[...] + b_ref[...]
    res = r_ref[...].astype(jnp.float32) * rs_ref[...] + rb_ref[...]
    o_ref[...] = jnp.maximum(main + res, 0.0).astype(o_ref.dtype)


def _bn_add_relu(y, scale, shift, resid, rscale, rshift, td, out_dtype):
    m, cp = y.shape
    row = pl.BlockSpec((td, cp), lambda i: (i, 0))
    vec = pl.BlockSpec((1, cp), lambda i: (0, 0))
    return pl.pallas_call(
        _bn_add_relu_kernel,
        grid=(m // td,),
        out_shape=jax.ShapeDtypeStruct((m, cp), out_dtype),
        in_specs=[row, vec, vec, row, vec, vec],
        out_specs=row,
        compiler_params=pltpu.CompilerParams(
            dimension_semantics=("parallel",),
            vmem_limit_bytes=_VMEM_LIMIT),
    )(y, scale, shift, resid, rscale, rshift)


# ----------------------------------------------------------------------------
# Plain-JAX glue: im2col (stage 1 only), weight reshaping, BN stats folding
# ----------------------------------------------------------------------------
def _im2col(x_nhwc, ksize, stride, pad):
    n, h, w, c = x_nhwc.shape
    xp = jnp.pad(x_nhwc, ((0, 0), (pad, pad), (pad, pad), (0, 0)))
    ho = (h + 2 * pad - ksize) // stride + 1
    wo = (w + 2 * pad - ksize) // stride + 1
    cols = []
    for kh in range(ksize):
        for kw in range(ksize):
            cols.append(xp[:, kh:kh + ho * stride:stride,
                           kw:kw + wo * stride:stride, :])
    patches = jnp.stack(cols, axis=3)                 # [N, Ho, Wo, k*k, C]
    return patches.reshape(n * ho * wo, ksize * ksize * c), ho, wo


def _w_as_gemm(w_oihw):
    cout, cin, kh, kw = w_oihw.shape
    return jnp.transpose(w_oihw, (2, 3, 1, 0)).reshape(kh * kw * cin, cout)


def _pad_vec(v, cp):
    return _pad2d(v.reshape(1, -1).astype(jnp.float32), 1, cp)


def _finalize_stats(st, count, gamma_p, beta_p):
    cp = st.shape[-1]
    tot = st.reshape(-1, 8, cp).sum(axis=0)            # combine per-tile partials
    mean = tot[0:1, :] / count
    var = jnp.maximum(tot[1:2, :] / count - mean * mean, 0.0)   # biased (train)
    scale = gamma_p * lax.rsqrt(var + EPS)
    shift = beta_p - mean * scale
    return scale, shift


def _row_tile(m, cap=1024):
    best = 8
    for t in range(8, min(m, cap) + 1, 8):
        if m % t == 0:
            best = t
    return best


# ----------------------------------------------------------------------------
# Res_2d forward
# ----------------------------------------------------------------------------
def res_2d_forward(x_nchw, params, shape=3, stride=2, tm=1024):
    ksize, pad = shape, shape // 2
    x = jnp.transpose(x_nchw, (0, 2, 3, 1)).astype(jnp.float32)   # NHWC
    n, _, _, cin = x.shape
    cout = params["w1"].shape[0]
    diff = (stride != 1) or (cin != cout)
    cp = _round_up(cout, 128)                          # lane-dense channels

    # ---- stage 1: conv_1 (+ conv_3 shortcut) as one wide GEMM + stats ----
    p1, ho, wo = _im2col(x, ksize, stride, pad)
    m1, k1 = p1.shape
    assert (ho * wo) % 8 == 0, "per-image stage-2 tiling needs Ho*Wo % 8 == 0"
    tm1 = min(tm, _round_up(m1, 8))
    m1p = _round_up(m1, tm1)
    k1p = _k_align(k1)
    p1 = _pad2d(p1, m1p, k1p).astype(jnp.bfloat16)      # zero-padded rows/cols

    w_list = [params["w1"]] + ([params["w3"]] if diff else [])
    wcat = jnp.concatenate([_pad2d(_w_as_gemm(wi), k1p, cp) for wi in w_list],
                           axis=1).astype(jnp.bfloat16)
    ys, stats = _gemm_stats(p1, wcat, len(w_list), cp, tm1)

    # conv biases b1/b2/b3 cancel exactly under train-mode BatchNorm: dropped.
    s1, sh1 = _finalize_stats(stats[0], m1, _pad_vec(params["g1"], cp),
                              _pad_vec(params["be1"], cp))
    if diff:
        rs, rsh = _finalize_stats(stats[1], m1, _pad_vec(params["g3"], cp),
                                  _pad_vec(params["be3"], cp))
        resid = ys[1]                    # raw conv_3 output (bf16); BN in kernel C
    else:
        resid = _pad2d(x.reshape(m1, cin), m1, cp).astype(jnp.bfloat16)
        rs = jnp.ones((1, cp), jnp.float32)
        rsh = jnp.zeros((1, cp), jnp.float32)

    # ---- stage 2: fused BN1+ReLU + conv_2 with in-VMEM halo + BN2 stats ----
    w2r = jnp.transpose(params["w2"], (2, 3, 1, 0)).reshape(ksize * ksize,
                                                            cout, cout)
    w2r = jnp.pad(w2r, ((0, 0), (0, cp - cout), (0, cp - cout))
                  ).astype(jnp.bfloat16)
    y2, stats2 = _conv2_bn_stats(ys[0], s1, sh1, w2r, n, ho, wo, cp, ksize, pad)
    s2, sh2 = _finalize_stats(stats2, m1, _pad_vec(params["g2"], cp),
                              _pad_vec(params["be2"], cp))

    # ---- stage 3: BN2 + residual + ReLU ----
    out = _bn_add_relu(y2, s2, sh2, resid, rs, rsh, _row_tile(m1), jnp.float32)
    out = out[:, :cout].reshape(n, ho, wo, cout)
    return jnp.transpose(out, (0, 3, 1, 2))            # back to NCHW


# ----------------------------------------------------------------------------
# Pure-JAX reference (correctness check)
# ----------------------------------------------------------------------------
def _ref_conv(x, w, b, stride, pad):
    y = lax.conv_general_dilated(x, w, (stride, stride),
                                 [(pad, pad), (pad, pad)],
                                 dimension_numbers=("NCHW", "OIHW", "NCHW"))
    return y + b.reshape(1, -1, 1, 1)


def _ref_bn(x, g, b):
    mean = jnp.mean(x, axis=(0, 2, 3), keepdims=True)
    var = jnp.mean((x - mean) ** 2, axis=(0, 2, 3), keepdims=True)
    return ((x - mean) * lax.rsqrt(var + EPS) * g.reshape(1, -1, 1, 1)
            + b.reshape(1, -1, 1, 1))


def res_2d_reference(x, params, shape=3, stride=2):
    pad = shape // 2
    out = _ref_bn(_ref_conv(x, params["w1"], params["b1"], stride, pad),
                  params["g1"], params["be1"])
    out = jnp.maximum(out, 0.0)
    out = _ref_bn(_ref_conv(out, params["w2"], params["b2"], 1, pad),
                  params["g2"], params["be2"])
    cin, cout = x.shape[1], params["w1"].shape[0]
    if stride != 1 or cin != cout:
        x = _ref_bn(_ref_conv(x, params["w3"], params["b3"], stride, pad),
                    params["g3"], params["be3"])
    return jnp.maximum(x + out, 0.0)


# ----------------------------------------------------------------------------
def _init_params(key, cin, cout, shape):
    keys = jax.random.split(key, 12)
    p = {}
    p["w1"] = 0.1 * jax.random.normal(keys[0], (cout, cin, shape, shape), jnp.float32)
    p["b1"] = 0.1 * jax.random.normal(keys[1], (cout,), jnp.float32)
    p["g1"] = 1.0 + 0.1 * jax.random.normal(keys[2], (cout,), jnp.float32)
    p["be1"] = 0.1 * jax.random.normal(keys[3], (cout,), jnp.float32)
    p["w2"] = 0.1 * jax.random.normal(keys[4], (cout, cout, shape, shape), jnp.float32)
    p["b2"] = 0.1 * jax.random.normal(keys[5], (cout,), jnp.float32)
    p["g2"] = 1.0 + 0.1 * jax.random.normal(keys[6], (cout,), jnp.float32)
    p["be2"] = 0.1 * jax.random.normal(keys[7], (cout,), jnp.float32)
    p["w3"] = 0.1 * jax.random.normal(keys[8], (cout, cin, shape, shape), jnp.float32)
    p["b3"] = 0.1 * jax.random.normal(keys[9], (cout,), jnp.float32)
    p["g3"] = 1.0 + 0.1 * jax.random.normal(keys[10], (cout,), jnp.float32)
    p["be3"] = 0.1 * jax.random.normal(keys[11], (cout,), jnp.float32)
    return p


if __name__ == "__main__":
    key = jax.random.PRNGKey(0)
    k_x, k_p = jax.random.split(key)

    N, CIN, COUT, H, W = 2, 4, 8, 16, 16
    STRIDE, SHAPE = 2, 3

    x = jax.random.normal(k_x, (N, CIN, H, W), jnp.float32)
    params = _init_params(k_p, CIN, COUT, SHAPE)

    out = res_2d_forward(x, params, shape=SHAPE, stride=STRIDE)
    out = jax.block_until_ready(out)

    ref = jax.block_until_ready(res_2d_reference(x, params,
                                                 shape=SHAPE, stride=STRIDE))
    assert out.shape == (N, COUT, H // STRIDE, W // STRIDE), out.shape
    assert jnp.all(jnp.isfinite(out))
    assert jnp.allclose(out, ref, atol=5e-2, rtol=5e-2)

    print("KERNEL_OK")
</pallas_src>

<mosaic_0001>
module attributes {stable_mosaic.version = 11 : i64} {
  func.func @_gemm_stats_kernel(%arg0: i32, %arg1: memref<128x48xbf16, #tpu.memory_space<vmem>>, %arg2: memref<48x256xbf16, #tpu.memory_space<vmem>>, %arg3: memref<128x128xbf16, #tpu.memory_space<vmem>>, %arg4: memref<128x128xbf16, #tpu.memory_space<vmem>>, %arg5: memref<8x128xf32, #tpu.memory_space<vmem>>, %arg6: memref<8x128xf32, #tpu.memory_space<vmem>>) attributes {dimension_semantics = [#tpu.dimension_semantics<parallel>], iteration_bounds = array<i64: 1>, scalar_prefetch = 0 : i64, scratch_operands = 0 : i64, tpu.core_type = #tpu.core_type<tc>, window_params = [{transform_indices = @transform_0, window_bounds = array<i64: 128, 48>}, {pipeline_mode = #tpu.pipeline_mode<synchronous>, transform_indices = @transform_1, window_bounds = array<i64: 48, 256>}, {transform_indices = @transform_2, window_bounds = array<i64: 128, 128>}, {transform_indices = @transform_3, window_bounds = array<i64: 128, 128>}, {transform_indices = @transform_4, window_bounds = array<i64: 8, 128>}, {transform_indices = @transform_5, window_bounds = array<i64: 8, 128>}]} {
    %c0 = arith.constant 0 : index
    %c0_0 = arith.constant 0 : index
    %0 = vector.load %arg1[%c0, %c0_0] : memref<128x48xbf16, #tpu.memory_space<vmem>>, vector<128x48xbf16>
    %c0_1 = arith.constant 0 : index
    %c0_2 = arith.constant 0 : index
    %1 = vector.load %arg2[%c0_1, %c0_2] : memref<48x256xbf16, #tpu.memory_space<vmem>>, vector<48x256xbf16>
    %cst = arith.constant dense<0.000000e+00> : vector<128x256xf32>
    %2 = tpu.matmul %0, %1, %cst {dimension_numbers = #tpu.dot_dimension_numbers<[1], [0], [0], [1], [0, 0, 1, 1], [], []>} : vector<128x48xbf16>, vector<48x256xbf16>, vector<128x256xf32> -> vector<128x256xf32>
    %3 = vector.extract_strided_slice %2 {offsets = [0, 0], sizes = [128, 128], strides = [1, 1]} : vector<128x256xf32> to vector<128x128xf32>
    %4 = arith.truncf %3 : vector<128x128xf32> to vector<128x128xbf16>
    %c0_3 = arith.constant 0 : index
    %c0_4 = arith.constant 0 : index
    %5 = vector.load %arg3[%c0_3, %c0_4] : memref<128x128xbf16, #tpu.memory_space<vmem>>, vector<128x128xbf16>
    tpu.vector_store %arg3[%c0_3, %c0_4], %4 {strides = array<i32>} : memref<128x128xbf16, #tpu.memory_space<vmem>>, vector<128x128xbf16>,
    %cst_5 = arith.constant 0.000000e+00 : f32
    %6 = vector.broadcast %cst_5 : f32 to vector<8x128xf32>
    %c0_6 = arith.constant 0 : index
    %c0_7 = arith.constant 0 : index
    %7 = vector.load %arg5[%c0_6, %c0_7] : memref<8x128xf32, #tpu.memory_space<vmem>>, vector<8x128xf32>
    tpu.vector_store %arg5[%c0_6, %c0_7], %6 {strides = array<i32>} : memref<8x128xf32, #tpu.memory_space<vmem>>, vector<8x128xf32>,
    %cst_8 = arith.constant dense<0.000000e+00> : vector<128xf32>
    %8 = vector.multi_reduction <add>, %3, %cst_8 [0] : vector<128x128xf32> to vector<128xf32>
    %9 = vector.shape_cast %8 : vector<128xf32> to vector<1x128xf32>
    %c0_9 = arith.constant 0 : index
    %c0_10 = arith.constant 0 : index
    %10 = vector.load %arg5[%c0_9, %c0_10] : memref<8x128xf32, #tpu.memory_space<vmem>>, vector<1x128xf32>
    tpu.vector_store %arg5[%c0_9, %c0_10], %9 {strides = array<i32>} : memref<8x128xf32, #tpu.memory_space<vmem>>, vector<1x128xf32>,
    %11 = arith.mulf %3, %3 : vector<128x128xf32>
    %cst_11 = arith.constant dense<0.000000e+00> : vector<128xf32>
    %12 = vector.multi_reduction <add>, %11, %cst_11 [0] : vector<128x128xf32> to vector<128xf32>
    %13 = vector.shape_cast %12 : vector<128xf32> to vector<1x128xf32>
    %c1 = arith.constant 1 : index
    %c0_12 = arith.constant 0 : index
    %14 = vector.load %arg5[%c1, %c0_12] : memref<8x128xf32, #tpu.memory_space<vmem>>, vector<1x128xf32>
    tpu.vector_store %arg5[%c1, %c0_12], %13 {strides = array<i32>} : memref<8x128xf32, #tpu.memory_space<vmem>>, vector<1x128xf32>,
    %15 = vector.extract_strided_slice %2 {offsets = [0, 128], sizes = [128, 128], strides = [1, 1]} : vector<128x256xf32> to vector<128x128xf32>
    %16 = arith.truncf %15 : vector<128x128xf32> to vector<128x128xbf16>
    %c0_13 = arith.constant 0 : index
    %c0_14 = arith.constant 0 : index
    %17 = vector.load %arg4[%c0_13, %c0_14] : memref<128x128xbf16, #tpu.memory_space<vmem>>, vector<128x128xbf16>
    tpu.vector_store %arg4[%c0_13, %c0_14], %16 {strides = array<i32>} : memref<128x128xbf16, #tpu.memory_space<vmem>>, vector<128x128xbf16>,
    %cst_15 = arith.constant 0.000000e+00 : f32
    %18 = vector.broadcast %cst_15 : f32 to vector<8x128xf32>
    %c0_16 = arith.constant 0 : index
    %c0_17 = arith.constant 0 : index
    %19 = vector.load %arg6[%c0_16, %c0_17] : memref<8x128xf32, #tpu.memory_space<vmem>>, vector<8x128xf32>
    tpu.vector_store %arg6[%c0_16, %c0_17], %18 {strides = array<i32>} : memref<8x128xf32, #tpu.memory_space<vmem>>, vector<8x128xf32>,
    %cst_18 = arith.constant dense<0.000000e+00> : vector<128xf32>
    %20 = vector.multi_reduction <add>, %15, %cst_18 [0] : vector<128x128xf32> to vector<128xf32>
    %21 = vector.shape_cast %20 : vector<128xf32> to vector<1x128xf32>
    %c0_19 = arith.constant 0 : index
    %c0_20 = arith.constant 0 : index
    %22 = vector.load %arg6[%c0_19, %c0_20] : memref<8x128xf32, #tpu.memory_space<vmem>>, vector<1x128xf32>
    tpu.vector_store %arg6[%c0_19, %c0_20], %21 {strides = array<i32>} : memref<8x128xf32, #tpu.memory_space<vmem>>, vector<1x128xf32>,
    %23 = arith.mulf %15, %15 : vector<128x128xf32>
    %cst_21 = arith.constant dense<0.000000e+00> : vector<128xf32>
    %24 = vector.multi_reduction <add>, %23, %cst_21 [0] : vector<128x128xf32> to vector<128xf32>
    %25 = vector.shape_cast %24 : vector<128xf32> to vector<1x128xf32>
    %c1_22 = arith.constant 1 : index
    %c0_23 = arith.constant 0 : index
    %26 = vector.load %arg6[%c1_22, %c0_23] : memref<8x128xf32, #tpu.memory_space<vmem>>, vector<1x128xf32>
    tpu.vector_store %arg6[%c1_22, %c0_23], %25 {strides = array<i32>} : memref<8x128xf32, #tpu.memory_space<vmem>>, vector<1x128xf32>,
    return
  }
  func.func @transform_0(%arg0: i32) -> (i32, i32) {
    %c0_i32 = arith.constant 0 : i32
    %c0_i32_0 = arith.constant 0 : i32
    return %arg0, %c0_i32 : i32, i32
  }
  func.func @transform_1(%arg0: i32) -> (i32, i32) {
    %c0_i32 = arith.constant 0 : i32
    %c0_i32_0 = arith.constant 0 : i32
    %c0_i32_1 = arith.constant 0 : i32
    return %c0_i32, %c0_i32_0 : i32, i32
  }
  func.func @transform_2(%arg0: i32) -> (i32, i32) {
    %c0_i32 = arith.constant 0 : i32
    %c0_i32_0 = arith.constant 0 : i32
    return %arg0, %c0_i32 : i32, i32
  }
  func.func @transform_3(%arg0: i32) -> (i32, i32) {
    %c0_i32 = arith.constant 0 : i32
    %c0_i32_0 = arith.constant 0 : i32
    return %arg0, %c0_i32 : i32, i32
  }
  func.func @transform_4(%arg0: i32) -> (i32, i32) {
    %c0_i32 = arith.constant 0 : i32
    %c0_i32_0 = arith.constant 0 : i32
    return %arg0, %c0_i32 : i32, i32
  }
  func.func @transform_5(%arg0: i32) -> (i32, i32) {
    %c0_i32 = arith.constant 0 : i32
    %c0_i32_0 = arith.constant 0 : i32
    return %arg0, %c0_i32 : i32, i32
  }
}

</mosaic_0001>

<bundles_post_ra>
// kernel: tpu_custom_call.1
= control target key start
LH: loop header
LB: loop body
LE: loop exit
PB: predicated region body
PF: predicated region fallthrough
CT: control target
= control target key end

     0   :  { %11 = vsyncpa [#allocation3], 0  ;;  %s1141_s0 = inlined_call_operand.vmem [shape: bf16[128,48], index: 0, kind: input, shape index: {}]   ;;  %s1142_s1 = inlined_call_operand.vmem [shape: bf16[48,256], index: 1, kind: input, shape index: {}]   ;;  %s1143_s2 = inlined_call_operand.hbm [shape: bf16[128,128], index: 2, kind: output, shape index: {0}]   ;;  %s1144_s3 = inlined_call_operand.hbm [shape: bf16[128,128], index: 3, kind: output, shape index: {1}]   ;;  %s1145_s4 = inlined_call_operand.hbm [shape: f32[8,128], index: 4, kind: output, shape index: {2}]   ;;  %s1146_s5 = inlined_call_operand.hbm [shape: f32[8,128], index: 5, kind: output, shape index: {3}]  }
   0x1   :  { %12 = vsyncpa [#allocation5], 0  ;;  %v784_v0 = vld [vmem:[%s1142_s1 + $0x4] ss:$8 sps:$4 sm:$0xff]   ;;  %v786_v1 = vld [vmem:[%s1142_s1] ss:$8 sps:$4 sm:$0xff]  }
   0x2   :  { %v895_v2 = vmov 0   ;;  %136 = vmatprep.subr.bf16.mxu0 %v784_v0  ;;  %v787_v3 = vld [vmem:[%s1142_s1 + $0x14] ss:$8 sps:$4 sm:$0xff]   ;;  %770 = vmatprep.subr.bf16.mxu1 %v784_v0  ;;  %v789_v4 = vld [vmem:[%s1142_s1 + $0x10] ss:$8 sps:$4 sm:$0xff]   ;;  %v793_v7 = vld [vmem:[%s1141_s0] sm:$0xff]  }
   0x3   :  { %168 = vmatprep.mubr.bf16.mxu0 %v895_v2  ;;  %208 = vmatprep.mubr.bf16.mxu1 %v895_v2  ;;  %v790_v5 = vld [vmem:[%s1142_s1 + $0x24] ss:$8 sps:$4 sm:$0xff]   ;;  %v792_v6 = vld [vmem:[%s1142_s1 + $0x20] ss:$8 sps:$4 sm:$0xff]   ;;  %vm111_vm0 = vcmask 392192  }
   0x4   :  { %137 = vmatpush1.bf16.msra.mxu0 %v786_v1  ;;  %773 = vmatpush1.bf16.msra.mxu1 %v786_v1  ;;  %v795_v8 = vld [vmem:[%s1141_s0 + $0x20] sm:$0xff]  }
   0x5   :  { %138 = vmatprep.subr.bf16.mxu0 %v787_v3  ;;  %771 = vmatprep.subr.bf16.mxu1 %v787_v3 }
   0x8   :  { %139 = vmatpush1.bf16.msra.mxu0 %v789_v4  ;;  %774 = vmatpush1.bf16.msra.mxu1 %v789_v4 }
   0x9   :  { %140 = vmatprep.subr.bf16.mxu0 %v790_v5  ;;  %772 = vmatprep.subr.bf16.mxu1 %v790_v5 }
   0xc   :  { %141 = vmatpush1.bf16.msra.mxu0 %v792_v6  ;;  %775 = vmatpush1.bf16.msra.mxu1 %v792_v6 }
   0xd   :  { %13 = vsyncpa [#allocation8], 0  ;;  %v794_v9 = vld [vmem:[%s1141_s0 + $0x8] sm:$0xff]   ;;  %v796_v11 = vld [vmem:[%s1141_s0 + $0x10] sm:$0xff]   ;;  %v896_v15 = vmov 0.0   ;;  %s898_s21 = smov [#allocation4]  }
   0xe   :  { %v797_v10 = vld [vmem:[%s1141_s0 + $0x28] sm:$0xff]   ;;  %v799_v12 = vld [vmem:[%s1141_s0 + $0x30] sm:$0xff]   ;;  %v798_v13 = vld [vmem:[%s1141_s0 + $0x18] sm:$0xff]   ;;  %329 = vst [vmem:[#allocation6] sm:$0xff] %v896_v15  ;;  %s548_s22 = sshll.u32 %s898_s21, 4  ;;  %s1039_s22 = int_to_ptr.vmem [resolvable:$true] %s548_s22 }
   0xf   :  { %604 = vmatmul.mubr.msk.bf16.vlgmr.msra.gmra.mrb[0].mxu0 %vm111_vm0, %v793_v7  ;;  %608 = vmatmul.mubr.msk.bf16.vlgmr.msra.gmra.mrb[0].mxu1 %vm111_vm0, %v795_v8  ;;  %v800_v14 = vld [vmem:[%s1141_s0 + $0x38] sm:$0xff]   ;;  %470 = vst [vmem:[#allocation7] sm:$0xff] %v896_v15  ;;  %s897_s0 = smov [#allocation2]  }
  0x10   :  { %178 = vmatprep.mubr.bf16.mxu0 %v895_v2  ;;  %218 = vmatprep.mubr.bf16.mxu1 %v895_v2  ;;  %s536_s20 = sshll.u32 %s897_s0, 4  ;;  %s1032_s20 = int_to_ptr.vmem [resolvable:$true] %s536_s20 }
  0x11   :  { %s801_s23 = scalar_lea.vmem %s1032_s20, 1024  ;;  %p806_p1 = scmp.lt.s32.totalorder %s1032_s20, %s1032_s20 }
  0x12   :  { %p802_p0 = scmp.ne.s32.totalorder %s1032_s20, %s801_s23  ;;  %p807_p2 = scmp.lt.s32.totalorder %s801_s23, %s801_s23 }
  0x14   :  { %p808_p3 = por %p807_p2, %p806_p1 }
  0x16   :  { %p809_p4 = pnand %p808_p3, %p802_p0 }
  0x17   :  { %605 = vmatmul.mubr.msk.bf16.gmra.mrb[4].mxu0 %vm111_vm0, %v794_v9  ;;  %609 = vmatmul.mubr.msk.bf16.gmra.mrb[4].mxu1 %vm111_vm0, %v797_v10 }
  0x18   :  { %188 = vmatprep.mubr.bf16.mxu0 %v895_v2  ;;  %228 = vmatprep.mubr.bf16.mxu1 %v895_v2 }
  0x1f   :  { %606 = vmatmul.mubr.msk.bf16.gmra.mrb[8].mxu0 %vm111_vm0, %v796_v11  ;;  %610 = vmatmul.mubr.msk.bf16.gmra.mrb[8].mxu1 %vm111_vm0, %v799_v12 }
  0x20   :  { %198 = vmatprep.mubr.bf16.mxu0 %v895_v2  ;;  %238 = vmatprep.mubr.bf16.mxu1 %v895_v2 }
  0x27   :  { %607 = vmatmul.mubr.msk.bf16.gmra.mrb[12].mxu0 %vm111_vm0, %v798_v13  ;;  %611 = vmatmul.mubr.msk.bf16.gmra.mrb[12].mxu1 %vm111_vm0, %v800_v14 }
  0xe2   :  { %v170_v16 = vpop.f32.mrb[0].mxu0  ;;  %v983_v17 = vpop.f32.mrb[0].mxu1 }
  0xe3   :  { %v172_v18 = vpop.f32.mrb[1].mxu0  ;;  %v985_v19 = vpop.f32.mrb[1].mxu1  ;;  %v352_v20 = vmul.f32 %v170_v16, %v170_v16 }
  0xe4   :  { %v174_v21 = vpop.f32.mrb[2].mxu0  ;;  %v987_v22 = vpop.f32.mrb[2].mxu1  ;;  %v493_v29 = vmul.f32 %v172_v18, %v172_v18 }
  0xe5   :  { %v679_v23 = vpack.c.bf16 %v174_v21, %v170_v16  ;;  %v330_v24 = vadd.f32 %v174_v21, %v170_v16  ;;  %v353_v25 = vmul.f32 %v174_v21, %v174_v21  ;;  %v176_v26 = vpop.f32.mrb[3].mxu0  ;;  %v699_v27 = vpack.c.bf16 %v987_v22, %v983_v17  ;;  %v991_v28 = vpop.f32.mrb[3].mxu1 }
  0xe6   :  { %v719_v30 = vpack.c.bf16 %v176_v26, %v172_v18  ;;  %v471_v31 = vadd.f32 %v176_v26, %v172_v18  ;;  %v494_v32 = vmul.f32 %v176_v26, %v176_v26  ;;  %v739_v34 = vpack.c.bf16 %v991_v28, %v985_v19 }
  0xe7   :  { %680 = vst [vmem:[#allocation2] sm:$0xff] %v679_v23   ;;  %v368_v33 = vadd.f32 %v353_v25, %v352_v20  ;;  %759 = vst [vmem:[#allocation2 + $0x20] sm:$0xff] %v699_v27  }
  0xe8   :  { %720 = vst [vmem:[#allocation4] sm:$0xff] %v719_v30   ;;  %v509_v35 = vadd.f32 %v494_v32, %v493_v29  ;;  %766 = vst [vmem:[#allocation4 + $0x20] sm:$0xff] %v739_v34  }
  0xea   :  { %v180_v36 = vpop.f32.mrb[4].mxu0  ;;  %v995_v37 = vpop.f32.mrb[4].mxu1 }
  0xeb   :  { %v331_v38 = vadd.f32 %v330_v24, %v180_v36  ;;  %v354_v39 = vmul.f32 %v180_v36, %v180_v36  ;;  %v182_v40 = vpop.f32.mrb[5].mxu0  ;;  %v997_v41 = vpop.f32.mrb[5].mxu1 }
  0xec   :  { %v472_v42 = vadd.f32 %v471_v31, %v182_v40  ;;  %v495_v43 = vmul.f32 %v182_v40, %v182_v40  ;;  %v184_v44 = vpop.f32.mrb[6].mxu0  ;;  %v999_v45 = vpop.f32.mrb[6].mxu1 }
  0xed   :  { %v369_v46 = vadd.f32 %v368_v33, %v354_v39  ;;  %v684_v47 = vpack.c.bf16 %v184_v44, %v180_v36  ;;  %v332_v48 = vadd.f32 %v331_v38, %v184_v44  ;;  %v355_v49 = vmul.f32 %v184_v44, %v184_v44  ;;  %v186_v50 = vpop.f32.mrb[7].mxu0  ;;  %v1001_v51 = vpop.f32.mrb[7].mxu1 }
  0xee   :  { %v510_v52 = vadd.f32 %v509_v35, %v495_v43  ;;  %v724_v53 = vpack.c.bf16 %v186_v50, %v182_v40  ;;  %v473_v54 = vadd.f32 %v472_v42, %v186_v50  ;;  %v496_v55 = vmul.f32 %v186_v50, %v186_v50 }
  0xef   :  { %756 = vst [vmem:[#allocation2 + $0x8] sm:$0xff] %v684_v47   ;;  %v370_v56 = vadd.f32 %v369_v46, %v355_v49  ;;  %v704_v57 = vpack.c.bf16 %v999_v45, %v995_v37  ;;  %v744_v58 = vpack.c.bf16 %v1001_v51, %v997_v41  ;;  %v360_v47 = vmul.f32 %v983_v17, %v983_v17 }
  0xf0   :  { %763 = vst [vmem:[#allocation4 + $0x8] sm:$0xff] %v724_v53   ;;  %v511_v59 = vadd.f32 %v510_v52, %v496_v55  ;;  %v501_v52 = vmul.f32 %v985_v19, %v985_v19 }
  0xf1   :  { %760 = vst [vmem:[#allocation2 + $0x28] sm:$0xff] %v704_v57   ;;  %767 = vst [vmem:[#allocation4 + $0x28] sm:$0xff] %v744_v58   ;;  %v502_v58 = vmul.f32 %v991_v28, %v991_v28 }
  0xf2   :  { %v190_v60 = vpop.f32.mrb[8].mxu0  ;;  %v1007_v61 = vpop.f32.mrb[8].mxu1 }
  0xf3   :  { %v333_v62 = vadd.f32 %v332_v48, %v190_v60  ;;  %v356_v63 = vmul.f32 %v190_v60, %v190_v60  ;;  %v192_v0 = vpop.f32.mrb[9].mxu0  ;;  %v1009_v1 = vpop.f32.mrb[9].mxu1 }
  0xf4   :  { %v474_v2 = vadd.f32 %v473_v54, %v192_v0  ;;  %v497_v3 = vmul.f32 %v192_v0, %v192_v0  ;;  %v194_v4 = vpop.f32.mrb[10].mxu0  ;;  %v1011_v5 = vpop.f32.mrb[10].mxu1 }
  0xf5   :  { %v371_v6 = vadd.f32 %v370_v56, %v356_v63  ;;  %v689_v7 = vpack.c.bf16 %v194_v4, %v190_v60  ;;  %v334_v8 = vadd.f32 %v333_v62, %v194_v4  ;;  %v357_v9 = vmul.f32 %v194_v4, %v194_v4  ;;  %v196_v10 = vpop.f32.mrb[11].mxu0  ;;  %v1013_v11 = vpop.f32.mrb[11].mxu1 }
  0xf6   :  { %v512_v12 = vadd.f32 %v511_v59, %v497_v3  ;;  %v729_v13 = vpack.c.bf16 %v196_v10, %v192_v0  ;;  %v475_v14 = vadd.f32 %v474_v2, %v196_v10  ;;  %v498_v15 = vmul.f32 %v196_v10, %v196_v10 }
  0xf7   :  { %757 = vst [vmem:[#allocation2 + $0x10] sm:$0xff] %v689_v7   ;;  %v372_v16 = vadd.f32 %v371_v6, %v357_v9  ;;  %v709_v18 = vpack.c.bf16 %v1011_v5, %v1007_v61  ;;  %v749_v20 = vpack.c.bf16 %v1013_v11, %v1009_v1 }
  0xf8   :  { %764 = vst [vmem:[#allocation4 + $0x10] sm:$0xff] %v729_v13   ;;  %v513_v21 = vadd.f32 %v512_v12, %v498_v15 }
  0xf9   :  { %761 = vst [vmem:[#allocation2 + $0x30] sm:$0xff] %v709_v18   ;;  %768 = vst [vmem:[#allocation4 + $0x30] sm:$0xff] %v749_v20  }
  0xfa   :  { %v200_v23 = vpop.f32.mrb[12].mxu0  ;;  %v1019_v24 = vpop.f32.mrb[12].mxu1 }
  0xfb   :  { %v335_v25 = vadd.f32 %v334_v8, %v200_v23  ;;  %v358_v26 = vmul.f32 %v200_v23, %v200_v23  ;;  %v202_v27 = vpop.f32.mrb[13].mxu0  ;;  %v1021_v29 = vpop.f32.mrb[13].mxu1 }
  0xfc   :  { %v476_v30 = vadd.f32 %v475_v14, %v202_v27  ;;  %v499_v31 = vmul.f32 %v202_v27, %v202_v27  ;;  %v204_v32 = vpop.f32.mrb[14].mxu0  ;;  %v1023_v33 = vpop.f32.mrb[14].mxu1 }
  0xfd   :  { %v373_v34 = vadd.f32 %v372_v16, %v358_v26  ;;  %v694_v35 = vpack.c.bf16 %v204_v32, %v200_v23  ;;  %v336_v36 = vadd.f32 %v335_v25, %v204_v32  ;;  %v359_v38 = vmul.f32 %v204_v32, %v204_v32  ;;  %v206_v39 = vpop.f32.mrb[15].mxu0  ;;  %v1025_v40 = vpop.f32.mrb[15].mxu1 }
  0xfe   :  { %v514_v42 = vadd.f32 %v513_v21, %v499_v31  ;;  %v734_v43 = vpack.c.bf16 %v206_v39, %v202_v27  ;;  %v477_v44 = vadd.f32 %v476_v30, %v206_v39  ;;  %v500_v46 = vmul.f32 %v206_v39, %v206_v39 }
  0xff   :  { %758 = vst [vmem:[#allocation2 + $0x18] sm:$0xff] %v694_v35   ;;  %v337_v48 = vadd.f32 %v336_v36, %v983_v17  ;;  %v374_v49 = vadd.f32 %v373_v34, %v359_v38  ;;  %v714_v50 = vpack.c.bf16 %v1023_v33, %v1019_v24  ;;  %v754_v55 = vpack.c.bf16 %v1025_v40, %v1021_v29 }
 0x100   :  { %765 = vst [vmem:[#allocation4 + $0x18] sm:$0xff] %v734_v43   ;;  %v478_v53 = vadd.f32 %v477_v44, %v985_v19  ;;  %v515_v54 = vadd.f32 %v514_v42, %v500_v46  ;;  %v361_v17 = vmul.f32 %v987_v22, %v987_v22 }
 0x101   :  { %v338_v56 = vadd.f32 %v337_v48, %v987_v22  ;;  %v375_v57 = vadd.f32 %v374_v49, %v360_v47  ;;  %762 = vst [vmem:[#allocation2 + $0x38] sm:$0xff] %v714_v50   ;;  %769 = vst [vmem:[#allocation4 + $0x38] sm:$0xff] %v754_v55  }
 0x102   :  { %v479_v59 = vadd.f32 %v478_v53, %v991_v28  ;;  %v516_v60 = vadd.f32 %v515_v54, %v501_v52 }
 0x103   :  { %812 = shalt.err (!%p809_p4)
}
 0x104   :  { %s813_s26 = scalar_lea.hbm %s1143_s2, 1024 }
 0x105   :  { %p814_p5 = scmp.ne.s32.totalorder %s1143_s2, %s813_s26  ;;  %p817_p6 = scmp.lt.u32.totalorder %s813_s26, %s1143_s2 }
 0x107   :  { %p819_p7 = pnand %p817_p6, %p814_p5 }
 0x109   :  { %822 = shalt.err (!%p819_p7)
}
 0x10a   :  { %s899_s6 = smov 64   ;;  %s900_s7 = smov 4   ;;  %v362_v19 = vmul.f32 %v995_v37, %v995_v37  ;;  %v376_v22 = vadd.f32 %v375_v57, %v361_v17  ;;  %v339_v28 = vadd.f32 %v338_v56, %v995_v37 }
 0x10b   :  { %542 = dma.vmem_to_hbm [thread:$0]  %s1032_s20, 1024, %s1143_s2, [#allocation3], %s899_s6, %s899_s6, %s900_s7  }
 0x10c   :  { %s823_s9 = scalar_lea.vmem %s1039_s22, 1024  ;;  %p828_p9 = scmp.lt.s32.totalorder %s1039_s22, %s1039_s22 }
 0x10d   :  { %p824_p8 = scmp.ne.s32.totalorder %s1039_s22, %s823_s9  ;;  %p829_p10 = scmp.lt.s32.totalorder %s823_s9, %s823_s9 }
 0x10f   :  { %p830_p11 = por %p829_p10, %p828_p9 }
 0x111   :  { %p831_p12 = pnand %p830_p11, %p824_p8 }
 0x113   :  { %834 = shalt.err (!%p831_p12)
}
 0x114   :  { %s835_s12 = scalar_lea.hbm %s1144_s3, 1024 }
 0x115   :  { %p836_p13 = scmp.ne.s32.totalorder %s1144_s3, %s835_s12  ;;  %p839_p0 = scmp.lt.u32.totalorder %s835_s12, %s1144_s3 }
 0x117   :  { %p841_p1 = pnand %p839_p0, %p836_p13 }
 0x119   :  { %844 = shalt.err (!%p841_p1)
}
 0x11a   :  { %554 = dma.vmem_to_hbm [thread:$0]  %s1039_s22, 1024, %s1144_s3, [#allocation5], %s899_s6, %s899_s6, %s900_s7   ;;  %v503_v37 = vmul.f32 %v997_v41, %v997_v41  ;;  %v517_v62 = vadd.f32 %v516_v60, %v502_v58  ;;  %v480_v63 = vadd.f32 %v479_v59, %v997_v41  ;;  %v363_v0 = vmul.f32 %v999_v45, %v999_v45 }
 0x11b   :  { %v340_v2 = vadd.f32 %v339_v28, %v999_v45  ;;  %v377_v3 = vadd.f32 %v376_v22, %v362_v19  ;;  %v504_v4 = vmul.f32 %v1001_v51, %v1001_v51  ;;  %v364_v9 = vmul.f32 %v1007_v61, %v1007_v61  ;;  %s901_s3 = smov [#allocation6]   ;;  %s902_s19 = smov [#allocation7]  }
 0x11c   :  { %v481_v6 = vadd.f32 %v480_v63, %v1001_v51  ;;  %v518_v7 = vadd.f32 %v517_v62, %v503_v37  ;;  %v505_v12 = vmul.f32 %v1009_v1, %v1009_v1  ;;  %v365_v15 = vmul.f32 %v1011_v5, %v1011_v5  ;;  %s561_s18 = sshll.u32 %s901_s3, 4  ;;  %s571_s0 = sshll.u32 %s902_s19, 4  ;;  %s562_s18 = int_to_ptr.vmem [resolvable:$true] %s561_s18  ;;  %s572_s0 = int_to_ptr.vmem [resolvable:$true] %s571_s0 }
 0x11d   :  { %v341_v8 = vadd.f32 %v340_v2, %v1007_v61  ;;  %v378_v10 = vadd.f32 %v377_v3, %v363_v0  ;;  %v366_v51 = vmul.f32 %v1019_v24, %v1019_v24  ;;  %v506_v61 = vmul.f32 %v1013_v11, %v1013_v11  ;;  %s845_s20 = scalar_lea.vmem %s562_s18, 128  ;;  %p850_p3 = scmp.lt.s32.totalorder %s562_s18, %s562_s18 }
 0x11e   :  { %v482_v41 = vadd.f32 %v481_v6, %v1009_v1  ;;  %v519_v13 = vadd.f32 %v518_v7, %v504_v4  ;;  %v507_v20 = vmul.f32 %v1021_v29, %v1021_v29  ;;  %v367_v27 = vmul.f32 %v1023_v33, %v1023_v33  ;;  %p846_p2 = scmp.ne.s32.totalorder %s562_s18, %s845_s20  ;;  %p851_p4 = scmp.lt.s32.totalorder %s845_s20, %s845_s20 }
 0x11f   :  { %v379_v45 = vadd.f32 %v378_v10, %v364_v9  ;;  %v342_v14 = vadd.f32 %v341_v8, %v1011_v5 }
 0x120   :  { %v520_v16 = vadd.f32 %v519_v13, %v505_v12  ;;  %v483_v18 = vadd.f32 %v482_v41, %v1013_v11  ;;  %v508_v11 = vmul.f32 %v1025_v40, %v1025_v40  ;;  %p852_p5 = por %p851_p4, %p850_p3 }
 0x121   :  { %v380_v1 = vadd.f32 %v379_v45, %v365_v15  ;;  %v343_v21 = vadd.f32 %v342_v14, %v1019_v24 }
 0x122   :  { %v521_v23 = vadd.f32 %v520_v16, %v506_v61  ;;  %v484_v25 = vadd.f32 %v483_v18, %v1021_v29  ;;  %p853_p6 = pnand %p852_p5, %p846_p2 }
 0x123   :  { %v381_v26 = vadd.f32 %v380_v1, %v366_v51  ;;  %v344_v5 = vadd.f32 %v343_v21, %v1023_v33 }
 0x124   :  { %v522_v30 = vadd.f32 %v521_v23, %v507_v20  ;;  %v485_v31 = vadd.f32 %v484_v25, %v1025_v40 }
 0x125   :  { %v345_v32 = vrot.slane %v344_v5, 4  ;;  %v382_v34 = vadd.f32 %v381_v26, %v367_v27 }
 0x126   :  { %v486_v35 = vrot.slane %v485_v31, 4  ;;  %v523_v36 = vadd.f32 %v522_v30, %v508_v11 }
 0x127   :  { %v346_v24 = vadd.f32 %v345_v32, %v344_v5  ;;  %v383_v38 = vrot.slane %v382_v34, 4 }
 0x128   :  { %v487_v39 = vadd.f32 %v486_v35, %v485_v31  ;;  %v524_v29 = vrot.slane %v523_v36, 4 }
 0x129   :  { %v347_v42 = vrot.slane %v346_v24, 2  ;;  %v384_v43 = vadd.f32 %v383_v38, %v382_v34 }
 0x12a   :  { %v488_v44 = vrot.slane %v487_v39, 2  ;;  %v525_v46 = vadd.f32 %v524_v29, %v523_v36 }
 0x12b   :  { %v348_v47 = vadd.f32 %v347_v42, %v346_v24  ;;  %v385_v33 = vrot.slane %v384_v43, 2 }
 0x12c   :  { %v489_v48 = vadd.f32 %v488_v44, %v487_v39  ;;  %v526_v49 = vrot.slane %v525_v46, 2 }
 0x12d   :  { %v349_v50 = vrot.slane %v348_v47, 1  ;;  %v386_v52 = vadd.f32 %v385_v33, %v384_v43 }
 0x12e   :  { %v490_v53 = vrot.slane %v489_v48, 1  ;;  %v527_v40 = vadd.f32 %v526_v49, %v525_v46 }
 0x12f   :  { %v350_v54 = vadd.f32 %v349_v50, %v348_v47  ;;  %v387_v55 = vrot.slane %v386_v52, 1 }
 0x130   :  { %v491_v17 = vadd.f32 %v490_v53, %v489_v48  ;;  %v528_v56 = vrot.slane %v527_v40, 1 }
 0x131   :  { %351 = vst [vmem:[#allocation6] sm:$0x1] %v350_v54  ;;  %v388_v57 = vadd.f32 %v387_v55, %v386_v52 }
 0x132   :  { %492 = vst [vmem:[#allocation7] sm:$0x1] %v491_v17  ;;  %v529_v58 = vadd.f32 %v528_v56, %v527_v40 }
 0x133   :  { %389 = vst [vmem:[#allocation6 + $0x1] sm:$0x1] %v388_v57 }
 0x134   :  { %856 = shalt.err (!%p853_p6)
}
 0x135   :  { %s857_s23 = scalar_lea.hbm %s1145_s4, 128 }
 0x136   :  { %p858_p7 = scmp.ne.s32.totalorder %s1145_s4, %s857_s23  ;;  %p861_p8 = scmp.lt.u32.totalorder %s857_s23, %s1145_s4 }
 0x138   :  { %p863_p9 = pnand %p861_p8, %p858_p7 }
 0x13a   :  { %866 = shalt.err (!%p863_p9)
}
 0x13b   :  { %564 = dma.vmem_to_hbm [thread:$0]  %s562_s18, 128, %s1145_s4, [#allocation5]   ;;  %530 = vst [vmem:[#allocation7 + $0x1] sm:$0x1] %v529_v58 }
 0x13c   :  { %s867_s30 = scalar_lea.vmem %s572_s0, 128  ;;  %p872_p11 = scmp.lt.s32.totalorder %s572_s0, %s572_s0 }
 0x13d   :  { %p868_p10 = scmp.ne.s32.totalorder %s572_s0, %s867_s30  ;;  %p873_p12 = scmp.lt.s32.totalorder %s867_s30, %s867_s30 }
 0x13f   :  { %p874_p13 = por %p873_p12, %p872_p11 }
 0x141   :  { %p875_p0 = pnand %p874_p13, %p868_p10 }
 0x143   :  { %878 = shalt.err (!%p875_p0)
}
 0x144   :  { %s879_s8 = scalar_lea.hbm %s1146_s5, 128 }
 0x145   :  { %p880_p1 = scmp.ne.s32.totalorder %s1146_s5, %s879_s8  ;;  %p883_p2 = scmp.lt.u32.totalorder %s879_s8, %s1146_s5 }
 0x147   :  { %p885_p3 = pnand %p883_p2, %p880_p1 }
 0x149   :  { %888 = shalt.err (!%p885_p3)
}
 0x14a   :  { %574 = dma.vmem_to_hbm [thread:$0]  %s572_s0, 128, %s1146_s5, [#allocation8]  }
 0x14b   :  { %889 = dma.done.wait [#allocation3], 1024  }
 0x14c   :  { %890 = vsyncadd [#allocation3], 4294966272 }
 0x14d   :  { %891 = dma.done.wait [#allocation5], 1152  }
 0x14e   :  { %892 = vsyncadd [#allocation5], 4294966144 }
 0x14f   :  { %893 = dma.done.wait [#allocation8], 128  }
 0x150   :  { %894 = vsyncadd [#allocation8], 4294967168 }
 0x151   :  { %587 = vsyncpa [#allocation3], 1 }
 0x152   :  { %588 = vsyncpa [#allocation5], 1 }
 0x153   :  { %589 = vsyncpa [#allocation8], 1 }

</bundles_post_ra>
